<compile_context>
chip_gen: v6e
topology: v6e:2x2x1
jax: 0.10.0
libtpu: 0.0.40
codegen_flags: <defaults>
</compile_context>

<pallas_src>
import functools
import numpy as np
import jax
import jax.numpy as jnp
from jax.experimental import pallas as pl
from jax.experimental.pallas import tpu as pltpu


def _round_up(x, m):
    return (x + m - 1) // m * m


def _divisors_desc(n, cap):
    return [d for d in range(min(n, cap), 0, -1) if n % d == 0]


def _vmem_limit_bytes():
    # Per-generation scoped-VMEM limit (v5e default is only 16 MiB; v7x has
    # 64 MiB physical).  Fall back to the smallest (v7x) if the query fails.
    try:
        cap = int(pltpu.get_tpu_info().vmem_capacity_bytes)
    except Exception:
        cap = 64 * 1024 * 1024
    return max(32 << 20, min(cap - (16 << 20), 100 << 20))


def _pick_modw_batch(B, cap=8):
    # second-to-last block dim must be a multiple of 8 or the full extent
    for dv in _divisors_desc(B, cap):
        if dv % 8 == 0 or dv == B:
            return dv
    return B


def _pick_cols_tile(n, max_tile=2048):
    # lane tile over the Cout*Cin columns of the cond-MLP output
    if n <= max_tile:
        return n
    best = n
    for dv in range(128, max_tile + 1, 128):
        if n % dv == 0:
            best = dv
    return best


def _pick_conv_tiling(B, Cout, cin_rows, KKC, n_taps, halo_pad, L_valid,
                      tap_loop, out_isz, budget, max_lane_tile):
    """VMEM-aware choice of the batch block BB and the L lane tile."""
    def need(bb, lt):
        n = 2 * bb * Cout * KKC * 2                     # wmod block, double-buffered, bf16
        n += bb * cin_rows * (lt + halo_pad) * 2        # x scratch (bf16)
        if (not tap_loop) and n_taps > 1:
            n += bb * KKC * lt * 2                      # concat patch temporary
        n += bb * Cout * lt * 4                         # f32 accumulator
        n += 2 * bb * Cout * lt * out_isz               # output block, double-buffered
        return n

    lt_cap = max(128, min(_round_up(L_valid, 128), _round_up(max_lane_tile, 128)))
    bb = 1
    for cand in _divisors_desc(B, 8):
        if need(cand, 128) <= budget:
            bb = cand
            break
    lt = 128
    for cand in range(lt_cap, 127, -128):
        if need(bb, cand) <= budget:
            lt = cand
            break
    return bb, lt


# ---------------- fused cond-MLPs + per-sample weight modulation -------------
def _modw_kernel(c_ref, sw1_ref, sb1_ref, sw2_ref, sb2_ref,
                 hw1_ref, hb1_ref, hw2_ref, hb2_ref, wt_ref, o_ref):
    cc = c_ref[...]                                                   # (BBm, D) f32
    hs = jnp.maximum(
        jnp.dot(cc, sw1_ref[...], preferred_element_type=jnp.float32) + sb1_ref[...], 0.0)
    hh = jnp.maximum(
        jnp.dot(cc, hw1_ref[...], preferred_element_type=jnp.float32) + hb1_ref[...], 0.0)
    scale = jnp.dot(hs, sw2_ref[...], preferred_element_type=jnp.float32) + sb2_ref[...]
    shift = jnp.dot(hh, hw2_ref[...], preferred_element_type=jnp.float32) + hb2_ref[...]
    # scale/shift: (BBm, NT) with column index o*Cin + ci.
    # wt: (KK, NT) -> modulated weight (BBm, KK, NT) via pure broadcasts (no reshape).
    o_ref[...] = (wt_ref[...][None, :, :] * scale[:, None, :]
                  + shift[:, None, :]).astype(o_ref.dtype)


# ---------------- conv: L-tiled, halo via manual DMA, one/few MXU matmuls ----
def _cconv_kernel(w_ref, x_hbm, o_ref, xbuf, sem, *, offs, lt, bb, tap_loop):
    b = pl.program_id(0)
    l = pl.program_id(1)
    start = pl.multiple_of(l * lt, 128)
    width = xbuf.shape[2]                               # lt + halo_pad (static)
    # Overlapping (halo-widened) x window for this (batch block, L tile).
    cp = pltpu.make_async_copy(
        x_hbm.at[pl.ds(b * bb, bb), :, pl.ds(start, width)], xbuf, sem)
    cp.start()
    cp.wait()
    # TODO(synk): double-buffer this DMA across L tiles (prefetch l+1) if the
    # copy shows up exposed in profiles; kept synchronous for simplicity.

    w = w_ref[...]
    if tap_loop:
        # Large-Cin path: per-tap (Cout,Cin)x(Cin,L) dots, f32 accumulation,
        # no KKx concat copy in VMEM.  w is (BB, KK, Cout, Cin).
        acc = jnp.einsum('boc,bcl->bol', w[:, 0],
                         xbuf[:, :, offs[0]:offs[0] + lt],
                         preferred_element_type=jnp.float32)
        for t in range(1, len(offs)):
            acc = acc + jnp.einsum('boc,bcl->bol', w[:, t],
                                   xbuf[:, :, offs[t]:offs[t] + lt],
                                   preferred_element_type=jnp.float32)
    else:
        # Small-Cin path: fold the KK taps into one big contraction.
        # w is (BB, Cout, KK*Cin); patch rows are ordered (tap, channel).
        if len(offs) == 1:
            patch = xbuf[:, :, offs[0]:offs[0] + lt]
        else:
            patch = jnp.concatenate(
                [xbuf[:, :, off:off + lt] for off in offs], axis=1)
        acc = jnp.einsum('bok,bkl->bol', w, patch,
                         preferred_element_type=jnp.float32)
    o_ref[...] = acc.astype(o_ref.dtype)


# ---------------------------------- wrapper ----------------------------------
def cconv2d_forward(x, c, weight, scales_params, shifts_params,
                    stride=1, padding=0, dilation=1,
                    out_dtype=jnp.bfloat16, max_lane_tile=2048,
                    force_tap_loop=None):
    B, Cin, H, W = x.shape
    Cout, Cin_w, KH, KW = weight.shape
    assert Cin_w == Cin, "groups != 1 not supported (module's scale view assumes groups=1)"
    s, p, d = stride, padding, dilation
    Hout = (H + 2 * p - d * (KH - 1) - 1) // s + 1
    Wout = (W + 2 * p - d * (KW - 1) - 1) // s + 1
    KK = KH * KW
    KKC = KK * Cin
    Ncols = Cout * Cin
    D = c.shape[1]

    vmem_limit = _vmem_limit_bytes()
    budget = int(0.5 * vmem_limit)

    # ---------- stage 1: cond MLPs + weight modulation (gridded) -------------
    s_w1, s_b1, s_w2, s_b2 = scales_params
    h_w1, h_b1, h_w2, h_b2 = shifts_params
    sw1t, sb1 = s_w1.T, s_b1[None, :]
    sw2t, sb2 = s_w2.T, s_b2[None, :]          # (D, Cout*Cin), (1, Cout*Cin)
    hw1t, hb1 = h_w1.T, h_b1[None, :]
    hw2t, hb2 = h_w2.T, h_b2[None, :]
    # weight rearranged to (KK, Cout*Cin): row t = kh*KW+kw, column n = o*Cin+ci.
    w_t = weight.transpose(2, 3, 0, 1).reshape(KK, Ncols)

    BBm = _pick_modw_batch(B)
    NT = _pick_cols_tile(Ncols, 2048)
    wmod_t = pl.pallas_call(
        _modw_kernel,
        grid=(B // BBm, Ncols // NT),
        in_specs=[
            pl.BlockSpec((BBm, D), lambda b, n: (b, 0)),     # c
            pl.BlockSpec((D, D), lambda b, n: (0, 0)),       # scales.linear1 W^T
            pl.BlockSpec((1, D), lambda b, n: (0, 0)),       # scales.linear1 b
            pl.BlockSpec((D, NT), lambda b, n: (0, n)),      # scales.linear2 W^T cols
            pl.BlockSpec((1, NT), lambda b, n: (0, n)),      # scales.linear2 b
            pl.BlockSpec((D, D), lambda b, n: (0, 0)),       # shifts.linear1 W^T
            pl.BlockSpec((1, D), lambda b, n: (0, 0)),       # shifts.linear1 b
            pl.BlockSpec((D, NT), lambda b, n: (0, n)),      # shifts.linear2 W^T cols
            pl.BlockSpec((1, NT), lambda b, n: (0, n)),      # shifts.linear2 b
            pl.BlockSpec((KK, NT), lambda b, n: (0, n)),     # base weight (KK, N) cols
        ],
        out_specs=pl.BlockSpec((BBm, KK, NT), lambda b, n: (b, 0, n)),
        out_shape=jax.ShapeDtypeStruct((B, KK, Ncols), jnp.bfloat16),
        compiler_params=pltpu.CompilerParams(
            dimension_semantics=("parallel", "parallel"),
            vmem_limit_bytes=vmem_limit),
    )(c, sw1t, sb1, sw2t, sb2, hw1t, hb1, hw2t, hb2, w_t)

    tap_loop = (Cin >= 128) if force_tap_loop is None else bool(force_tap_loop)
    if s != 1:
        tap_loop = False

    # ---------- arrange the image for the L-tiled conv matmul ----------------
    if s == 1:
        Hpad, Wpad = H + 2 * p, W + 2 * p
        Wrow_a = _round_up(Wpad, 128)
        # lane-align the row stride when the junk-column overhead is modest
        Wrow = Wrow_a if Wrow_a <= 2 * Wpad else Wpad
        offs = tuple(kh * d * Wrow + kw * d for kh in range(KH) for kw in range(KW))
        halo = max(offs)
        halo_pad = _round_up(halo, 128) if halo else 0
        L_valid = Hout * Wrow
        cin_rows = Cin
        xflat = jnp.pad(x, ((0, 0), (0, 0), (p, p), (p, p + Wrow - Wpad))
                        ).reshape(B, Cin, Hpad * Wrow)
    else:
        # TODO(synk): move the stride>1 tap gather into the kernel (strided DMA
        # windows) to avoid the KKx im2col read amplification in HBM.
        HW = Hout * Wout
        xpad = jnp.pad(x, ((0, 0), (0, 0), (p, p), (p, p)))
        taps = []
        for kh in range(KH):
            for kw in range(KW):
                sl = xpad[:, :,
                          kh * d: kh * d + (Hout - 1) * s + 1: s,
                          kw * d: kw * d + (Wout - 1) * s + 1: s]
                taps.append(sl.reshape(B, Cin, HW))
        xflat = jnp.concatenate(taps, axis=1)            # (B, KK*Cin, HW)
        offs = (0,)
        halo_pad = 0
        L_valid = HW
        cin_rows = KKC
        Wrow = None

    out_isz = jnp.dtype(out_dtype).itemsize
    BB, lt = _pick_conv_tiling(B, Cout, cin_rows, KKC, len(offs), halo_pad,
                               L_valid, tap_loop, out_isz, budget, max_lane_tile)
    nL = pl.cdiv(L_valid, lt)
    L_total = nL * lt
    L_in = L_total + halo_pad
    x_in = jnp.pad(xflat, ((0, 0), (0, 0), (0, max(0, L_in - xflat.shape[2])))
                   ).astype(jnp.bfloat16)

    # wmod in the layout the chosen conv variant wants
    wmod4 = wmod_t.reshape(B, KK, Cout, Cin)
    if tap_loop:
        wmod_in = wmod4                                           # (B, KK, Cout, Cin)
        w_spec = pl.BlockSpec((BB, KK, Cout, Cin), lambda b, l: (b, 0, 0, 0))
    else:
        wmod_in = wmod4.transpose(0, 2, 1, 3).reshape(B, Cout, KKC)  # (B, Cout, KK*Cin)
        w_spec = pl.BlockSpec((BB, Cout, KKC), lambda b, l: (b, 0, 0))

    kernel = functools.partial(_cconv_kernel, offs=offs, lt=lt, bb=BB,
                               tap_loop=tap_loop)
    flops = 2 * B * Cout * KKC * L_total
    bytes_acc = int(x_in.size * 2 + wmod_in.size * 2 + B * Cout * L_total * out_isz)

    y = pl.pallas_call(
        kernel,
        grid=(B // BB, nL),
        in_specs=[w_spec, pl.BlockSpec(memory_space=pl.ANY)],
        out_specs=pl.BlockSpec((BB, Cout, lt), lambda b, l: (b, 0, l)),
        out_shape=jax.ShapeDtypeStruct((B, Cout, L_total), out_dtype),
        scratch_shapes=[
            pltpu.VMEM((BB, cin_rows, lt + halo_pad), jnp.bfloat16),
            pltpu.SemaphoreType.DMA(()),
        ],
        compiler_params=pltpu.CompilerParams(
            dimension_semantics=("parallel", "parallel"),
            vmem_limit_bytes=vmem_limit),
        cost_estimate=pl.CostEstimate(flops=flops, transcendentals=0,
                                      bytes_accessed=bytes_acc),
    )(wmod_in, x_in)

    # ---------- extract valid outputs and mirror the module's final .view ----
    if s == 1:
        y = y[:, :, :Hout * Wrow].reshape(B, Cout, Hout, Wrow)[..., :Wout]
    else:
        y = y[:, :, :Hout * Wout].reshape(B, Cout, Hout, Wout)

    # PyTorch does .view(-1, out_channels, height, width) with the INPUT H, W.
    assert (B * Hout * Wout) % (H * W) == 0, \
        "output spatial size incompatible with the module's .view(-1, C, H, W)"
    return y.reshape(-1, Cout, H, W)


# ------------------- pure-JAX reference for correctness ----------------------
def _ref_forward(x, c, weight, scales_params, shifts_params, stride, padding, dilation):
    B, Cin, H, W = x.shape
    Cout = weight.shape[0]

    def mlp(cc, w1, b1, w2, b2):
        h = jnp.maximum(cc @ w1.T + b1, 0.0)
        return h @ w2.T + b2

    scale = mlp(c, *scales_params).reshape(B, Cout, Cin, 1, 1)
    shift = mlp(c, *shifts_params).reshape(B, Cout, Cin, 1, 1)
    w = weight[None] * scale + shift                       # (B, Cout, Cin, KH, KW)
    outs = []
    for b in range(B):
        yb = jax.lax.conv_general_dilated(
            x[b:b + 1], w[b],
            window_strides=(stride, stride),
            padding=((padding, padding), (padding, padding)),
            rhs_dilation=(dilation, dilation),
            dimension_numbers=("NCHW", "OIHW", "NCHW"))
        outs.append(yb)
    y = jnp.concatenate(outs, axis=0)
    return y.reshape(-1, Cout, H, W)


if __name__ == "__main__":
    B, Cin, Cout = 2, 4, 8
    H = W = 16
    K, stride, padding, dilation = 3, 1, 1, 1   # 'same'-size conv, as the module's view() implies
    cond_dim = 32

    key = jax.random.PRNGKey(0)
    ks = jax.random.split(key, 12)
    x = jax.random.normal(ks[0], (B, Cin, H, W), jnp.float32)
    c = jax.random.normal(ks[1], (B, cond_dim), jnp.float32)

    fan_in = Cin * K * K
    bound = 1.0 / np.sqrt(fan_in)
    weight = jax.random.uniform(ks[2], (Cout, Cin, K, K), jnp.float32, -bound, bound)
    _unused_bias = jax.random.uniform(ks[3], (1, Cout, 1, 1), jnp.float32, -bound, bound)
    # TODO(synk): self.bias is declared in __init__ but never added in forward(); kept unused on purpose.

    def lin_init(kw_, kb_, out_d, in_d, scl=0.1):
        w = scl * jax.random.normal(kw_, (out_d, in_d), jnp.float32)
        b = scl * jax.random.normal(kb_, (out_d,), jnp.float32)
        return w, b

    s_w1, s_b1 = lin_init(ks[4], ks[5], cond_dim, cond_dim)
    s_w2, s_b2 = lin_init(ks[6], ks[7], Cin * Cout, cond_dim)
    s_b2 = s_b2 + 1.0   # scales.linear2.bias is ones in the module
    h_w1, h_b1 = lin_init(ks[8], ks[9], cond_dim, cond_dim)
    h_w2, h_b2 = lin_init(ks[10], ks[11], Cin * Cout, cond_dim)

    scales_params = (s_w1, s_b1, s_w2, s_b2)
    shifts_params = (h_w1, h_b1, h_w2, h_b2)

    y_ref = _ref_forward(x, c, weight, scales_params, shifts_params,
                         stride, padding, dilation)

    # Fold path (small Cin): KK taps folded into one (Cout, KK*Cin) x (KK*Cin, L)
    # matmul.  max_lane_tile=256 forces >=2 L tiles so the halo-DMA path runs.
    y = cconv2d_forward(x, c, weight, scales_params, shifts_params,
                        stride=stride, padding=padding, dilation=dilation,
                        max_lane_tile=256)
    y = jax.block_until_ready(y)
    np.testing.assert_allclose(np.asarray(y.astype(jnp.float32)), np.asarray(y_ref),
                               rtol=2e-2, atol=2e-2)

    # Per-tap accumulation path (the large-Cin variant), forced here for coverage.
    y2 = cconv2d_forward(x, c, weight, scales_params, shifts_params,
                         stride=stride, padding=padding, dilation=dilation,
                         max_lane_tile=256, force_tap_loop=True)
    y2 = jax.block_until_ready(y2)
    np.testing.assert_allclose(np.asarray(y2.astype(jnp.float32)), np.asarray(y_ref),
                               rtol=2e-2, atol=2e-2)

    print("KERNEL_OK")
</pallas_src>

<mosaic_0001>
module attributes {stable_mosaic.version = 11 : i64} {
  func.func @_modw_kernel(%arg0: i32, %arg1: i32, %arg2: memref<2x32xf32, #tpu.memory_space<vmem>>, %arg3: memref<32x32xf32, #tpu.memory_space<vmem>>, %arg4: memref<1x32xf32, #tpu.memory_space<vmem>>, %arg5: memref<32x32xf32, #tpu.memory_space<vmem>>, %arg6: memref<1x32xf32, #tpu.memory_space<vmem>>, %arg7: memref<32x32xf32, #tpu.memory_space<vmem>>, %arg8: memref<1x32xf32, #tpu.memory_space<vmem>>, %arg9: memref<32x32xf32, #tpu.memory_space<vmem>>, %arg10: memref<1x32xf32, #tpu.memory_space<vmem>>, %arg11: memref<9x32xf32, #tpu.memory_space<vmem>>, %arg12: memref<2x9x32xbf16, #tpu.memory_space<vmem>>) attributes {dimension_semantics = [#tpu.dimension_semantics<parallel>, #tpu.dimension_semantics<parallel>], iteration_bounds = array<i64: 1, 1>, scalar_prefetch = 0 : i64, scratch_operands = 0 : i64, tpu.core_type = #tpu.core_type<tc>, window_params = [{transform_indices = @transform_0, window_bounds = array<i64: 2, 32>}, {pipeline_mode = #tpu.pipeline_mode<synchronous>, transform_indices = @transform_1, window_bounds = array<i64: 32, 32>}, {pipeline_mode = #tpu.pipeline_mode<synchronous>, transform_indices = @transform_2, window_bounds = array<i64: 1, 32>}, {transform_indices = @transform_3, window_bounds = array<i64: 32, 32>}, {transform_indices = @transform_4, window_bounds = array<i64: 1, 32>}, {pipeline_mode = #tpu.pipeline_mode<synchronous>, transform_indices = @transform_5, window_bounds = array<i64: 32, 32>}, {pipeline_mode = #tpu.pipeline_mode<synchronous>, transform_indices = @transform_6, window_bounds = array<i64: 1, 32>}, {transform_indices = @transform_7, window_bounds = array<i64: 32, 32>}, {transform_indices = @transform_8, window_bounds = array<i64: 1, 32>}, {transform_indices = @transform_9, window_bounds = array<i64: 9, 32>}, {transform_indices = @transform_10, window_bounds = array<i64: 2, 9, 32>}]} {
    %c0 = arith.constant 0 : index
    %c0_0 = arith.constant 0 : index
    %0 = vector.load %arg2[%c0, %c0_0] : memref<2x32xf32, #tpu.memory_space<vmem>>, vector<2x32xf32>
    %c0_1 = arith.constant 0 : index
    %c0_2 = arith.constant 0 : index
    %1 = vector.load %arg3[%c0_1, %c0_2] : memref<32x32xf32, #tpu.memory_space<vmem>>, vector<32x32xf32>
    %cst = arith.constant dense<0.000000e+00> : vector<2x32xf32>
    %2 = tpu.matmul %0, %1, %cst {dimension_numbers = #tpu.dot_dimension_numbers<[1], [0], [0], [1], [0, 0, 1, 1], [], []>} : vector<2x32xf32>, vector<32x32xf32>, vector<2x32xf32> -> vector<2x32xf32>
    %c0_3 = arith.constant 0 : index
    %c0_4 = arith.constant 0 : index
    %3 = vector.load %arg4[%c0_3, %c0_4] : memref<1x32xf32, #tpu.memory_space<vmem>>, vector<1x32xf32>
    %4 = vector.broadcast %3 : vector<1x32xf32> to vector<2x32xf32>
    %5 = arith.addf %2, %4 : vector<2x32xf32>
    %cst_5 = arith.constant 0.000000e+00 : f32
    %6 = vector.broadcast %cst_5 : f32 to vector<2x32xf32>
    %7 = arith.maximumf %5, %6 : vector<2x32xf32>
    %c0_6 = arith.constant 0 : index
    %c0_7 = arith.constant 0 : index
    %8 = vector.load %arg7[%c0_6, %c0_7] : memref<32x32xf32, #tpu.memory_space<vmem>>, vector<32x32xf32>
    %cst_8 = arith.constant dense<0.000000e+00> : vector<2x32xf32>
    %9 = tpu.matmul %0, %8, %cst_8 {dimension_numbers = #tpu.dot_dimension_numbers<[1], [0], [0], [1], [0, 0, 1, 1], [], []>} : vector<2x32xf32>, vector<32x32xf32>, vector<2x32xf32> -> vector<2x32xf32>
    %c0_9 = arith.constant 0 : index
    %c0_10 = arith.constant 0 : index
    %10 = vector.load %arg8[%c0_9, %c0_10] : memref<1x32xf32, #tpu.memory_space<vmem>>, vector<1x32xf32>
    %11 = vector.broadcast %10 : vector<1x32xf32> to vector<2x32xf32>
    %12 = arith.addf %9, %11 : vector<2x32xf32>
    %cst_11 = arith.constant 0.000000e+00 : f32
    %13 = vector.broadcast %cst_11 : f32 to vector<2x32xf32>
    %14 = arith.maximumf %12, %13 : vector<2x32xf32>
    %c0_12 = arith.constant 0 : index
    %c0_13 = arith.constant 0 : index
    %15 = vector.load %arg5[%c0_12, %c0_13] : memref<32x32xf32, #tpu.memory_space<vmem>>, vector<32x32xf32>
    %cst_14 = arith.constant dense<0.000000e+00> : vector<2x32xf32>
    %16 = tpu.matmul %7, %15, %cst_14 {dimension_numbers = #tpu.dot_dimension_numbers<[1], [0], [0], [1], [0, 0, 1, 1], [], []>} : vector<2x32xf32>, vector<32x32xf32>, vector<2x32xf32> -> vector<2x32xf32>
    %c0_15 = arith.constant 0 : index
    %c0_16 = arith.constant 0 : index
    %17 = vector.load %arg6[%c0_15, %c0_16] : memref<1x32xf32, #tpu.memory_space<vmem>>, vector<1x32xf32>
    %18 = vector.broadcast %17 : vector<1x32xf32> to vector<2x32xf32>
    %19 = arith.addf %16, %18 : vector<2x32xf32>
    %c0_17 = arith.constant 0 : index
    %c0_18 = arith.constant 0 : index
    %20 = vector.load %arg9[%c0_17, %c0_18] : memref<32x32xf32, #tpu.memory_space<vmem>>, vector<32x32xf32>
    %cst_19 = arith.constant dense<0.000000e+00> : vector<2x32xf32>
    %21 = tpu.matmul %14, %20, %cst_19 {dimension_numbers = #tpu.dot_dimension_numbers<[1], [0], [0], [1], [0, 0, 1, 1], [], []>} : vector<2x32xf32>, vector<32x32xf32>, vector<2x32xf32> -> vector<2x32xf32>
    %c0_20 = arith.constant 0 : index
    %c0_21 = arith.constant 0 : index
    %22 = vector.load %arg10[%c0_20, %c0_21] : memref<1x32xf32, #tpu.memory_space<vmem>>, vector<1x32xf32>
    %23 = vector.broadcast %22 : vector<1x32xf32> to vector<2x32xf32>
    %24 = arith.addf %21, %23 : vector<2x32xf32>
    %c0_22 = arith.constant 0 : index
    %c0_23 = arith.constant 0 : index
    %25 = vector.load %arg11[%c0_22, %c0_23] : memref<9x32xf32, #tpu.memory_space<vmem>>, vector<9x32xf32>
    %26 = vector.shape_cast %25 : vector<9x32xf32> to vector<1x9x32xf32>
    %27 = vector.shape_cast %19 : vector<2x32xf32> to vector<2x1x32xf32>
    %28 = vector.broadcast %26 : vector<1x9x32xf32> to vector<2x9x32xf32>
    %29 = vector.broadcast %27 : vector<2x1x32xf32> to vector<2x9x32xf32>
    %30 = arith.mulf %28, %29 : vector<2x9x32xf32>
    %31 = vector.shape_cast %24 : vector<2x32xf32> to vector<2x1x32xf32>
    %32 = vector.broadcast %31 : vector<2x1x32xf32> to vector<2x9x32xf32>
    %33 = arith.addf %30, %32 : vector<2x9x32xf32>
    %34 = arith.truncf %33 : vector<2x9x32xf32> to vector<2x9x32xbf16>
    %c0_24 = arith.constant 0 : index
    %c0_25 = arith.constant 0 : index
    %c0_26 = arith.constant 0 : index
    %35 = vector.load %arg12[%c0_24, %c0_25, %c0_26] : memref<2x9x32xbf16, #tpu.memory_space<vmem>>, vector<2x9x32xbf16>
    tpu.vector_store %arg12[%c0_24, %c0_25, %c0_26], %34 {strides = array<i32>} : memref<2x9x32xbf16, #tpu.memory_space<vmem>>, vector<2x9x32xbf16>,
    return
  }
  func.func @transform_0(%arg0: i32, %arg1: i32) -> (i32, i32) {
    %c0_i32 = arith.constant 0 : i32
    %c0_i32_0 = arith.constant 0 : i32
    return %arg0, %c0_i32 : i32, i32
  }
  func.func @transform_1(%arg0: i32, %arg1: i32) -> (i32, i32) {
    %c0_i32 = arith.constant 0 : i32
    %c0_i32_0 = arith.constant 0 : i32
    %c0_i32_1 = arith.constant 0 : i32
    return %c0_i32, %c0_i32_0 : i32, i32
  }
  func.func @transform_2(%arg0: i32, %arg1: i32) -> (i32, i32) {
    %c0_i32 = arith.constant 0 : i32
    %c0_i32_0 = arith.constant 0 : i32
    %c0_i32_1 = arith.constant 0 : i32
    return %c0_i32, %c0_i32_0 : i32, i32
  }
  func.func @transform_3(%arg0: i32, %arg1: i32) -> (i32, i32) {
    %c0_i32 = arith.constant 0 : i32
    %c0_i32_0 = arith.constant 0 : i32
    return %c0_i32, %arg1 : i32, i32
  }
  func.func @transform_4(%arg0: i32, %arg1: i32) -> (i32, i32) {
    %c0_i32 = arith.constant 0 : i32
    %c0_i32_0 = arith.constant 0 : i32
    return %c0_i32, %arg1 : i32, i32
  }
  func.func @transform_5(%arg0: i32, %arg1: i32) -> (i32, i32) {
    %c0_i32 = arith.constant 0 : i32
    %c0_i32_0 = arith.constant 0 : i32
    %c0_i32_1 = arith.constant 0 : i32
    return %c0_i32, %c0_i32_0 : i32, i32
  }
  func.func @transform_6(%arg0: i32, %arg1: i32) -> (i32, i32) {
    %c0_i32 = arith.constant 0 : i32
    %c0_i32_0 = arith.constant 0 : i32
    %c0_i32_1 = arith.constant 0 : i32
    return %c0_i32, %c0_i32_0 : i32, i32
  }
  func.func @transform_7(%arg0: i32, %arg1: i32) -> (i32, i32) {
    %c0_i32 = arith.constant 0 : i32
    %c0_i32_0 = arith.constant 0 : i32
    return %c0_i32, %arg1 : i32, i32
  }
  func.func @transform_8(%arg0: i32, %arg1: i32) -> (i32, i32) {
    %c0_i32 = arith.constant 0 : i32
    %c0_i32_0 = arith.constant 0 : i32
    return %c0_i32, %arg1 : i32, i32
  }
  func.func @transform_9(%arg0: i32, %arg1: i32) -> (i32, i32) {
    %c0_i32 = arith.constant 0 : i32
    %c0_i32_0 = arith.constant 0 : i32
    return %c0_i32, %arg1 : i32, i32
  }
  func.func @transform_10(%arg0: i32, %arg1: i32) -> (i32, i32, i32) {
    %c0_i32 = arith.constant 0 : i32
    %c0_i32_0 = arith.constant 0 : i32
    return %arg0, %c0_i32, %arg1 : i32, i32, i32
  }
}

</mosaic_0001>

<bundles_post_ra>
// kernel: tpu_custom_call.1
= control target key start
LH: loop header
LB: loop body
LE: loop exit
PB: predicated region body
PF: predicated region fallthrough
CT: control target
= control target key end

     0   :  { %15 = vsyncpa [#allocation3], 0  ;;  %s1021_s0 = inlined_call_operand.hbm [shape: f32[2,32], index: 0, kind: input, shape index: {}]   ;;  %s1022_s1 = inlined_call_operand.hbm [shape: f32[32,32], index: 1, kind: input, shape index: {}]   ;;  %s1023_s2 = inlined_call_operand.hbm [shape: f32[1,32], index: 2, kind: input, shape index: {}]   ;;  %s1024_s3 = inlined_call_operand.hbm [shape: f32[32,32], index: 3, kind: input, shape index: {}]   ;;  %s1025_s4 = inlined_call_operand.hbm [shape: f32[1,32], index: 4, kind: input, shape index: {}]   ;;  %s1026_s5 = inlined_call_operand.hbm [shape: f32[32,32], index: 5, kind: input, shape index: {}]   ;;  %s1027_s6 = inlined_call_operand.hbm [shape: f32[1,32], index: 6, kind: input, shape index: {}]   ;;  %s1028_s7 = inlined_call_operand.hbm [shape: f32[32,32], index: 7, kind: input, shape index: {}]   ;;  %s1029_s8 = inlined_call_operand.hbm [shape: f32[1,32], index: 8, kind: input, shape index: {}]   ;;  %s1030_s9 = inlined_call_operand.vmem [shape: f32[9,32], index: 9, kind: input, shape index: {}]   ;;  %s1031_s10 = inlined_call_operand.vmem [shape: bf16[2,9,32], index: 10, kind: output, shape index: {}]  }
   0x1   :  { %16 = vsyncpa [#allocation5], 0 }
   0x2   :  { %17 = vsyncpa [#allocation8], 0 }
   0x3   :  { %18 = vsyncpa [#allocation11], 0 }
   0x4   :  { %19 = vsyncpa [#allocation14], 0  ;;  %s881_s13 = smov [#allocation4]  }
   0x5   :  { %s35_s14 = sshll.u32 %s881_s13, 4  ;;  %s36_s14 = int_to_ptr.vmem [resolvable:$true] %s35_s14 }
   0x6   :  { %s699_s15 = scalar_lea.vmem %s36_s14, 512  ;;  %p704_p1 = scmp.lt.s32.totalorder %s36_s14, %s36_s14 }
   0x7   :  { %p700_p0 = scmp.ne.s32.totalorder %s36_s14, %s699_s15  ;;  %p705_p2 = scmp.lt.s32.totalorder %s699_s15, %s699_s15 }
   0x9   :  { %p706_p3 = por %p705_p2, %p704_p1 }
   0xb   :  { %p707_p4 = pnand %p706_p3, %p700_p0 }
   0xd   :  { %710 = shalt.err (!%p707_p4)
}
   0xe   :  { %s882_s16 = smov 128   ;;  %s883_s17 = smov 8  }
   0xf   :  { %41 = dma.hbm_to_vmem [thread:$0]  %s1022_s1, 512, %s36_s14, [#allocation5], %s882_s16, %s882_s16, %s883_s17  }
  0x10   :  { %s884_s20 = smov [#allocation7]   ;;  %s885_s22 = smov [#allocation10]  }
  0x11   :  { %s57_s21 = sshll.u32 %s884_s20, 4  ;;  %s79_s23 = sshll.u32 %s885_s22, 4  ;;  %s58_s21 = int_to_ptr.vmem [resolvable:$true] %s57_s21  ;;  %s80_s23 = int_to_ptr.vmem [resolvable:$true] %s79_s23 }
  0x12   :  { %s719_s24 = scalar_lea.vmem %s58_s21, 512  ;;  %p724_p6 = scmp.lt.s32.totalorder %s58_s21, %s58_s21 }
  0x13   :  { %p720_p5 = scmp.ne.s32.totalorder %s58_s21, %s719_s24  ;;  %p725_p7 = scmp.lt.s32.totalorder %s719_s24, %s719_s24 }
  0x15   :  { %p726_p8 = por %p725_p7, %p724_p6 }
  0x17   :  { %p727_p9 = pnand %p726_p8, %p720_p5 }
  0x19   :  { %730 = shalt.err (!%p727_p9)
}
  0x1a   :  { %63 = dma.hbm_to_vmem [thread:$0]  %s1024_s3, 512, %s58_s21, [#allocation8], %s882_s16, %s882_s16, %s883_s17  }
  0x1b   :  { %s739_s1 = scalar_lea.vmem %s80_s23, 512  ;;  %p744_p11 = scmp.lt.s32.totalorder %s80_s23, %s80_s23 }
  0x1c   :  { %p740_p10 = scmp.ne.s32.totalorder %s80_s23, %s739_s1  ;;  %p745_p12 = scmp.lt.s32.totalorder %s739_s1, %s739_s1 }
  0x1e   :  { %p746_p13 = por %p745_p12, %p744_p11 }
  0x20   :  { %p747_p0 = pnand %p746_p13, %p740_p10 }
  0x22   :  { %750 = shalt.err (!%p747_p0)
}
  0x23   :  { %85 = dma.hbm_to_vmem [thread:$0]  %s1026_s5, 512, %s80_s23, [#allocation11], %s882_s16, %s882_s16, %s883_s17  }
  0x24   :  { %s886_s29 = smov [#allocation13]   ;;  %s887_s11 = smov [#allocation2]  }
  0x25   :  { %s101_s30 = sshll.u32 %s886_s29, 4  ;;  %s26_s3 = sshll.u32 %s887_s11, 4  ;;  %s102_s30 = int_to_ptr.vmem [resolvable:$true] %s101_s30  ;;  %s27_s3 = int_to_ptr.vmem [resolvable:$true] %s26_s3 }
  0x26   :  { %s759_s12 = scalar_lea.vmem %s102_s30, 512  ;;  %p764_p2 = scmp.lt.s32.totalorder %s102_s30, %s102_s30 }
  0x27   :  { %p760_p1 = scmp.ne.s32.totalorder %s102_s30, %s759_s12  ;;  %p765_p3 = scmp.lt.s32.totalorder %s759_s12, %s759_s12 }
  0x29   :  { %p766_p4 = por %p765_p3, %p764_p2 }
  0x2b   :  { %p767_p5 = pnand %p766_p4, %p760_p1 }
  0x2d   :  { %770 = shalt.err (!%p767_p5)
}
  0x2e   :  { %107 = dma.hbm_to_vmem [thread:$0]  %s1028_s7, 512, %s102_s30, [#allocation14], %s882_s16, %s882_s16, %s883_s17  }
  0x2f   :  { %s779_s5 = scalar_lea.vmem %s27_s3, 32  ;;  %p784_p7 = scmp.lt.s32.totalorder %s27_s3, %s27_s3 }
  0x30   :  { %p780_p6 = scmp.ne.s32.totalorder %s27_s3, %s779_s5  ;;  %p785_p8 = scmp.lt.s32.totalorder %s779_s5, %s779_s5 }
  0x32   :  { %p786_p9 = por %p785_p8, %p784_p7 }
  0x34   :  { %p787_p10 = pnand %p786_p9, %p780_p6 }
  0x36   :  { %790 = shalt.err (!%p787_p10)
}
  0x37   :  { %29 = dma.hbm_to_vmem [thread:$0]  %s1021_s0, 32, %s27_s3, [#allocation3]  }
  0x38   :  { %s888_s19 = smov [#allocation6]   ;;  %s889_s21 = smov [#allocation9]  }
  0x39   :  { %s48_s20 = sshll.u32 %s888_s19, 4  ;;  %s70_s22 = sshll.u32 %s889_s21, 4  ;;  %s49_s20 = int_to_ptr.vmem [resolvable:$true] %s48_s20  ;;  %s71_s22 = int_to_ptr.vmem [resolvable:$true] %s70_s22 }
  0x3a   :  { %s799_s23 = scalar_lea.vmem %s49_s20, 16  ;;  %s803_s7 = scalar_lea.vmem %s49_s20, 32 }
  0x3b   :  { %p800_p11 = scmp.ne.s32.totalorder %s49_s20, %s799_s23  ;;  %p804_p12 = scmp.lt.s32.totalorder %s49_s20, %s49_s20 }
  0x3c   :  { %p805_p13 = scmp.lt.s32.totalorder %s803_s7, %s799_s23 }
  0x3e   :  { %p806_p0 = por %p805_p13, %p804_p12 }
  0x40   :  { %p807_p1 = pnand %p806_p0, %p800_p11 }
  0x42   :  { %810 = shalt.err (!%p807_p1)
}
  0x43   :  { %51 = dma.hbm_to_vmem [thread:$0]  %s1023_s2, 16, %s49_s20, [#allocation5]  }
  0x44   :  { %s819_s24 = scalar_lea.vmem %s71_s22, 16  ;;  %s823_s0 = scalar_lea.vmem %s71_s22, 32 }
  0x45   :  { %p820_p2 = scmp.ne.s32.totalorder %s71_s22, %s819_s24  ;;  %p824_p3 = scmp.lt.s32.totalorder %s71_s22, %s71_s22 }
  0x46   :  { %p825_p4 = scmp.lt.s32.totalorder %s823_s0, %s819_s24 }
  0x48   :  { %p826_p5 = por %p825_p4, %p824_p3 }
  0x4a   :  { %p827_p6 = pnand %p826_p5, %p820_p2 }
  0x4c   :  { %830 = shalt.err (!%p827_p6)
}
  0x4d   :  { %73 = dma.hbm_to_vmem [thread:$0]  %s1025_s4, 16, %s71_s22, [#allocation8]  }
  0x4e   :  { %s890_s1 = smov [#allocation12]   ;;  %s891_s28 = smov [#allocation15]  }
  0x4f   :  { %s92_s27 = sshll.u32 %s890_s1, 4  ;;  %s114_s29 = sshll.u32 %s891_s28, 4  ;;  %s93_s27 = int_to_ptr.vmem [resolvable:$true] %s92_s27  ;;  %s115_s29 = int_to_ptr.vmem [resolvable:$true] %s114_s29 }
  0x50   :  { %s839_s30 = scalar_lea.vmem %s93_s27, 16  ;;  %s843_s2 = scalar_lea.vmem %s93_s27, 32 }
  0x51   :  { %p840_p7 = scmp.ne.s32.totalorder %s93_s27, %s839_s30  ;;  %p844_p8 = scmp.lt.s32.totalorder %s93_s27, %s93_s27 }
  0x52   :  { %p845_p9 = scmp.lt.s32.totalorder %s843_s2, %s839_s30 }
  0x54   :  { %p846_p10 = por %p845_p9, %p844_p8 }
  0x56   :  { %p847_p11 = pnand %p846_p10, %p840_p7 }
  0x58   :  { %850 = shalt.err (!%p847_p11)
}
  0x59   :  { %95 = dma.hbm_to_vmem [thread:$0]  %s1027_s6, 16, %s93_s27, [#allocation11]  }
  0x5a   :  { %s859_s12 = scalar_lea.vmem %s115_s29, 16  ;;  %s863_s4 = scalar_lea.vmem %s115_s29, 32 }
  0x5b   :  { %p860_p12 = scmp.ne.s32.totalorder %s115_s29, %s859_s12  ;;  %p864_p13 = scmp.lt.s32.totalorder %s115_s29, %s115_s29 }
  0x5c   :  { %p865_p0 = scmp.lt.s32.totalorder %s863_s4, %s859_s12 }
  0x5e   :  { %p866_p1 = por %p865_p0, %p864_p13 }
  0x60   :  { %p867_p2 = pnand %p866_p1, %p860_p12 }
  0x62   :  { %870 = shalt.err (!%p867_p2)
}
  0x63   :  { %117 = dma.hbm_to_vmem [thread:$0]  %s1029_s8, 16, %s115_s29, [#allocation14]  }
  0x64   :  { %871 = dma.done.wait [#allocation3], 32  }
  0x65   :  { %872 = vsyncadd [#allocation3], 4294967264 }
  0x66   :  { %873 = dma.done.wait [#allocation5], 528  }
  0x67   :  { %874 = vsyncadd [#allocation5], 4294966768 }
  0x68   :  { %875 = dma.done.wait [#allocation8], 528  }
  0x69   :  { %876 = vsyncadd [#allocation8], 4294966768 }
  0x6a   :  { %877 = dma.done.wait [#allocation11], 528  }
  0x6b   :  { %878 = vsyncadd [#allocation11], 4294966768 }
  0x6c   :  { %879 = dma.done.wait [#allocation14], 528  }
  0x6d   :  { %880 = vsyncadd [#allocation14], 4294966768  ;;  %v892_v0 = vmov 0.0   ;;  %vm893_vm0 = vmmov 0   ;;  %v151_v1 = vld [vmem:[#allocation4 + $0x18] sm:$0xff]  ;;  %v150_v3 = vld [vmem:[#allocation4 + $0x10] sm:$0xff]  ;;  %v490_v30 = vlaneseq }
  0x6e   :  { %633 = vmatprep.subr.mxu0 %v892_v0  ;;  %644 = vmatprep.subr.mxu1 %v892_v0  ;;  %v237_v2 = vld [vmem:[#allocation10 + $0x18] sm:$0xff]  ;;  %v236_v4 = vld [vmem:[#allocation10 + $0x10] sm:$0xff]  ;;  %v149_v5 = vld [vmem:[#allocation4 + $0x8] sm:$0xff]  ;;  %vm159_vm1 = vcmask 261120   ;;  %v894_v28 = vmov 1966171168  }
  0x6f   :  { %641 = vmatprep.mubr.msk.f32.mxu0 %vm893_vm0, %v892_v0  ;;  %652 = vmatprep.mubr.msk.f32.mxu1 %vm893_vm0, %v892_v0  ;;  %v235_v6 = vld [vmem:[#allocation10 + $0x8] sm:$0xff]  ;;  %v148_v7 = vld [vmem:[#allocation4] sm:$0xff]  ;;  %v147_v9 = vld [vmem:[#allocation2] sm:$0x3]  ;;  %v488_v29 = vunpack.c.l.s4 %v894_v28  ;;  %v491_v32 = vshrl.u32 %v490_v30, 7  ;;  %vm578_vm2 = vcmask 253952  }
  0x70   :  { %634 = vmatpush3.msra.mxu0 %v151_v1  ;;  %645 = vmatpush3.msra.mxu1 %v237_v2  ;;  %v234_v8 = vld [vmem:[#allocation10] sm:$0xff]  ;;  %v319_v10 = vld [vmem:[#allocation7 + $0x18] sm:$0xff]  ;;  %v318_v12 = vld [vmem:[#allocation7 + $0x10] sm:$0xff]  ;;  %vm579_vm3 = vsmask.f32 256  ;;  %vm576_vm4 = vcmask 257024  }
  0x71   :  { %635 = vmatprep.subr.mxu0 %v892_v0  ;;  %646 = vmatprep.subr.mxu1 %v892_v0  ;;  %v403_v11 = vld [vmem:[#allocation13 + $0x18] sm:$0xff]  ;;  %v402_v13 = vld [vmem:[#allocation13 + $0x10] sm:$0xff]  ;;  %v317_v14 = vld [vmem:[#allocation7 + $0x8] sm:$0xff]  ;;  %v489_v31 = vunpack.c.0.s8 %v488_v29  ;;  %v511_v43 = vsub.s32 0, %v491_v32 }
  0x72   :  { %636 = vmatpush3.msra.mxu0 %v150_v3  ;;  %647 = vmatpush3.msra.mxu1 %v236_v4  ;;  %v401_v15 = vld [vmem:[#allocation13 + $0x8] sm:$0xff]  ;;  %v316_v16 = vld [vmem:[#allocation7] sm:$0xff]  ;;  %v597_v18 = vld [vmem:[#allocation6] ss:$0 sm:$0xff] }
  0x73   :  { %637 = vmatprep.subr.mxu0 %v892_v0  ;;  %648 = vmatprep.subr.mxu1 %v892_v0  ;;  %v400_v17 = vld [vmem:[#allocation13] sm:$0xff]  ;;  %v599_v19 = vld [vmem:[#allocation12] ss:$0 sm:$0xff]  ;;  %v601_v33 = vld [vmem:[#allocation9] ss:$0 sm:$0xff]  ;;  %v492_v35 = vsub.s32 %v489_v31, %v491_v32 }
  0x74   :  { %638 = vmatpush3.msra.mxu0 %v149_v5  ;;  %649 = vmatpush3.msra.mxu1 %v235_v6  ;;  %v603_v34 = vld [vmem:[#allocation15] ss:$0 sm:$0xff]  ;;  %v484_v49 = vld [vmem:[%s1030_s9] sm:$0xff]  ;;  %v485_v50 = vld [vmem:[%s1030_s9 + $0x8] sm:$0x1] }
  0x75   :  { %639 = vmatprep.subr.mxu0 %v892_v0  ;;  %650 = vmatprep.subr.mxu1 %v892_v0  ;;  %vm580_vm5 = vmand %vm578_vm2, %vm579_vm3  ;;  %v581_v63 = vld [vmem:[%s1031_s10 + $0x4] sm:$0x1]  ;;  %v585_v4 = vld [vmem:[%s1031_s10 + $0xc] sm:$0x1] }
  0x76   :  { %640 = vmatpush3.msra.mxu0 %v148_v7  ;;  %651 = vmatpush3.msra.mxu1 %v234_v8 }
  0x77   :  { %642 = vmatmul.mubr.msk.f32.vlgmr.msra.gmra.mxu0 %vm159_vm1, %v147_v9  ;;  %653 = vmatmul.mubr.msk.f32.vlgmr.msra.gmra.mxu1 %vm159_vm1, %v147_v9 }
  0x78   :  { %655 = vmatprep.subr.mxu0 %v892_v0  ;;  %666 = vmatprep.subr.mxu1 %v892_v0 }
  0x79   :  { %656 = vmatpush3.msra.mxu0 %v319_v10  ;;  %667 = vmatpush3.msra.mxu1 %v403_v11 }
  0x7a   :  { %657 = vmatprep.subr.mxu0 %v892_v0  ;;  %668 = vmatprep.subr.mxu1 %v892_v0 }
  0x7b   :  { %663 = vmatprep.mubr.msk.f32.mxu0 %vm893_vm0, %v892_v0  ;;  %674 = vmatprep.mubr.msk.f32.mxu1 %vm893_vm0, %v892_v0 }
  0x7c   :  { %658 = vmatpush3.msra.mxu0 %v318_v12  ;;  %669 = vmatpush3.msra.mxu1 %v402_v13 }
  0x7d   :  { %659 = vmatprep.subr.mxu0 %v892_v0  ;;  %670 = vmatprep.subr.mxu1 %v892_v0 }
  0x7e   :  { %660 = vmatpush3.msra.mxu0 %v317_v14  ;;  %671 = vmatpush3.msra.mxu1 %v401_v15 }
  0x7f   :  { %661 = vmatprep.subr.mxu0 %v892_v0  ;;  %672 = vmatprep.subr.mxu1 %v892_v0 }
  0x80   :  { %662 = vmatpush3.msra.mxu0 %v316_v16  ;;  %673 = vmatpush3.msra.mxu1 %v400_v17 }
 0x137   :  { %v229_v20 = vpop.f32.mrf.mxu0  ;;  %v311_v21 = vpop.f32.mrf.mxu1 }
 0x138   :  { %v230_v22 = vadd.f32 %v597_v18, %v229_v20  ;;  %v312_v23 = vadd.f32 %v599_v19, %v311_v21 }
 0x139   :  { %v643_v24 = vpop.f32.mrf.mxu0  ;;  %v654_v25 = vpop.f32.mrf.mxu1 }
 0x13a   :  { %v233_v26 = vmax.f32 %v230_v22, 0.0  ;;  %v315_v27 = vmax.f32 %v312_v23, 0.0 }
 0x13c   :  { %664 = vmatmul.mubr.msk.f32.vlgmr.msra.gmra.mxu0 %vm159_vm1, %v233_v26  ;;  %675 = vmatmul.mubr.msk.f32.vlgmr.msra.gmra.mxu1 %vm159_vm1, %v315_v27 }
 0x1fc   :  { %v396_v36 = vpop.f32.mrf.mxu0  ;;  %v480_v37 = vpop.f32.mrf.mxu1 }
 0x1fd   :  { %v397_v38 = vadd.f32 %v601_v33, %v396_v36  ;;  %v481_v39 = vadd.f32 %v603_v34, %v480_v37 }
 0x1fe   :  { %v665_v40 = vpop.f32.mrf.mxu0  ;;  %v676_v41 = vpop.f32.mrf.mxu1 }
 0x1ff   :  { %v493_v42 = vrot.slane %v397_v38, %v492_v35  ;;  %v530_v44 = vrot.slane %v481_v39, %v492_v35 }
 0x201   :  { %v494_v45 = vcombine.high %v493_v42, %v493_v42  ;;  %v501_v46 = vrot.slane %v493_v42, %v492_v35  ;;  %v531_v47 = vcombine.high %v530_v44, %v530_v44  ;;  %v538_v48 = vrot.slane %v530_v44, %v492_v35 }
 0x203   :  { %v508_v51 = vrot.slane %v494_v45, %v492_v35  ;;  %v512_v52 = vrot.slane %v501_v46, %v511_v43  ;;  %v545_v53 = vrot.slane %v531_v47, %v492_v35  ;;  %v549_v54 = vrot.slane %v538_v48, %v511_v43 }
 0x205   :  { %v516_v55 = vrot.slane %v508_v51, %v511_v43  ;;  %v519_v56 = vmul.f32 %v512_v52, %v484_v49  ;;  %v520_v57 = vmul.f32 %v512_v52, %v485_v50  ;;  %v553_v58 = vrot.slane %v545_v53, %v511_v43 }
 0x207   :  { %v521_v59 = vmul.f32 %v516_v55, %v484_v49  ;;  %v522_v60 = vmul.f32 %v516_v55, %v485_v50  ;;  %v556_v61 = vadd.f32 %v549_v54, %v519_v56  ;;  %v557_v62 = vadd.f32 %v549_v54, %v520_v57 }
 0x209   :  { %v558_v0 = vadd.f32 %v553_v58, %v521_v59  ;;  %v559_v1 = vadd.f32 %v553_v58, %v522_v60  ;;  %v609_v2 = vpack.c.bf16 %v556_v61, %v556_v61  ;;  %v610_v3 = vpack.c.bf16 %v557_v62, %v557_v62 }
 0x20b   :  { %v611_v5 = vpack.c.bf16 %v558_v0, %v558_v0  ;;  %v612_v6 = vpack.c.bf16 %v559_v1, %v559_v1  ;;  %577 = vst.msk [vmem:[%s1031_s10] sm:$0xf] %vm576_vm4, %v609_v2  ;;  %v582_v7 = vsel %vm580_vm5, %v610_v3, %v581_v63 }
 0x20c   :  { %583 = vst [vmem:[%s1031_s10 + $0x4] sm:$0x1] %v582_v7 }
 0x20d   :  { %584 = vst.msk [vmem:[%s1031_s10 + $0x8] sm:$0xf] %vm576_vm4, %v611_v5  ;;  %v586_v8 = vsel %vm580_vm5, %v612_v6, %v585_v4 }
 0x20e   :  { %587 = vst [vmem:[%s1031_s10 + $0xc] sm:$0x1] %v586_v8 }
 0x20f   :  { %592 = vsyncpa [#allocation3], 1 }
 0x210   :  { %593 = vsyncpa [#allocation5], 1 }
 0x211   :  { %594 = vsyncpa [#allocation8], 1 }
 0x212   :  { %595 = vsyncpa [#allocation11], 1 }
 0x213   :  { %596 = vsyncpa [#allocation14], 1 }

</bundles_post_ra>
